<compile_context>
chip_gen: v7x
topology: tpu7x:2x2x1
jax: 0.10.0
libtpu: 0.0.40
codegen_flags: <defaults>
</compile_context>

<pallas_src>
import functools

import jax
import jax.numpy as jnp
from jax.experimental import pallas as pl
from jax.experimental.pallas import tpu as pltpu

NEG_SLOPE = 0.01   # torch.nn.functional.leaky_relu default
LANE = 128
SUBLANE = 8


def _leaky_relu(y):
    # slope < 1  =>  max(y, slope*y) == leaky_relu(y); 2 VPU ops (no select).
    return jnp.maximum(y, NEG_SLOPE * y)


def _ceil_to(x, m):
    return ((x + m - 1) // m) * m


# ----------------------------- fused kernel -------------------------------- #

def _make_fused_kernel(plan):
    """plan: list of (kind, out_pad); kind in {'skip_id', 'skip_proj', 'linear'}."""

    def kernel(*refs):
        x_ref, o_ref = refs[0], refs[-1]
        w_refs = refs[1:-1]                       # (w0, b0, w1, b1, ...)
        cur = x_ref[...].astype(jnp.float32)      # activations stay f32 in vregs
        idx = 0
        for kind, out_pad in plan:
            w = w_refs[idx][...]                  # bf16 [in_pad, out_pad or 2*out_pad]
            b = w_refs[idx + 1][...]              # f32  [1, same]
            idx += 2
            acc = jnp.dot(cur.astype(jnp.bfloat16), w,
                          preferred_element_type=jnp.float32) + b
            if kind == "skip_proj":
                # fused [main | shortcut] matmul -> split at 128-lane boundary
                cur = _leaky_relu(acc[:, :out_pad]) + acc[:, out_pad:]
            elif kind == "skip_id":
                # identity shortcut: previous activation is already the (padded)
                # shortcut value -> plain VPU add, no eye matmul.
                cur = _leaky_relu(acc) + cur
            else:                                 # final nn.Linear
                cur = acc
        o_ref[...] = cur.astype(o_ref.dtype)

    return kernel


# ----------------------------- param packing ------------------------------- #

def pack_params(params, in_sizes):
    """Pad feature dims to 128 lanes, cast weights to bf16 (bias kept f32), and
    fuse projected shortcuts into the main matmul ([in_pad, 2*out_pad])."""
    f32, bf16 = jnp.float32, jnp.bfloat16
    flat, plan = [], []
    in_total = sum(in_sizes)
    in_pad = _ceil_to(in_total, LANE)
    cur_true, cur_pad = in_total, in_pad

    for p in params[:-1]:                               # SkipLinear layers
        in_t, out_t = p["w"].shape
        assert in_t == cur_true
        out_pad = _ceil_to(out_t, LANE)
        if "ws" in p:                                   # projected shortcut
            w = jnp.zeros((cur_pad, 2 * out_pad), f32)
            w = w.at[:in_t, :out_t].set(p["w"])
            w = w.at[:in_t, out_pad:out_pad + out_t].set(p["ws"])
            b = jnp.zeros((1, 2 * out_pad), f32)
            b = b.at[:, :out_t].set(p["b"])
            b = b.at[:, out_pad:out_pad + out_t].set(p["bs"])
            plan.append(("skip_proj", out_pad))
        else:                                           # identity shortcut
            assert in_t == out_t, "identity shortcut requires in_size == out_size"
            w = jnp.zeros((cur_pad, out_pad), f32).at[:in_t, :out_t].set(p["w"])
            b = jnp.zeros((1, out_pad), f32).at[:, :out_t].set(p["b"])
            plan.append(("skip_id", out_pad))
        flat += [w.astype(bf16), b]
        cur_true, cur_pad = out_t, out_pad

    pf = params[-1]                                     # final nn.Linear
    in_t, out_t = pf["w"].shape
    assert in_t == cur_true
    out_pad = _ceil_to(out_t, LANE)
    w = jnp.zeros((cur_pad, out_pad), f32).at[:in_t, :out_t].set(pf["w"])
    b = jnp.zeros((1, out_pad), f32).at[:, :out_t].set(pf["b"])
    flat += [w.astype(bf16), b]
    plan.append(("linear", out_pad))
    return flat, plan, in_pad, out_pad, out_t


# ----------------------------- tiling helpers ------------------------------ #

def _pick_batch_tile(B):
    """Batch tile (tb) and padded batch (b_pad): minimise padding waste, keep tb
    sublane-aligned, and give >=2 grid steps at large B (v7x has 2 TensorCores)."""
    b_al = _ceil_to(B, SUBLANE)
    if b_al <= 256:
        return b_al, b_al
    best = None
    for tb in (1024, 768, 512, 256):
        b_pad = _ceil_to(b_al, tb)
        if b_pad // tb < 2:
            continue                        # keep both v7x TensorCores busy
        key = (b_pad - b_al, -tb)           # least padding, then biggest tile
        if best is None or key < best[0]:
            best = (key, tb, b_pad)
    if best is None:
        return 256, _ceil_to(b_al, 256)
    return best[1], best[2]


def _weight_spec(shape):
    # Constant index_map -> the block never changes; single-buffer it so the
    # pipeliner does not allocate 2x VMEM per resident weight.
    try:
        return pl.BlockSpec(shape, lambda i: (0, 0), pipeline_mode=pl.Buffered(1))
    except Exception:                       # older jax without pipeline_mode
        return pl.BlockSpec(shape, lambda i: (0, 0))


# ----------------------------- forward wrapper ------------------------------ #

def skip_mlp_forward(packed, plan, in_pad, out_pad, out_true, *args):
    B = args[0].shape[0]
    dtype = args[0].dtype

    # torch.hstack fused outside the kernel: one lane-dense [B_pad, in_pad] input.
    x = jnp.concatenate(args, axis=1)
    tb, b_pad = _pick_batch_tile(B)
    x = jnp.pad(x, ((0, b_pad - B), (0, in_pad - x.shape[1])))

    grid = (b_pad // tb,)
    in_specs = [pl.BlockSpec((tb, in_pad), lambda i: (i, 0))]
    in_specs += [_weight_spec(w.shape) for w in packed]
    out_specs = pl.BlockSpec((tb, out_pad), lambda i: (i, 0))   # lane-dense store

    # VMEM budget: resident weights (single-buffered) + double-buffered x/out
    # tiles + activation-value headroom.
    weight_bytes = sum(int(w.size) * w.dtype.itemsize for w in packed)
    max_feat = max([in_pad] + [2 * op if k == "skip_proj" else op for k, op in plan])
    budget = (weight_bytes
              + 2 * tb * in_pad * 4
              + 2 * tb * out_pad * 4
              + 4 * tb * max_feat * 4)
    vmem_limit = int(min(max(2 * budget, 32 << 20), 64 << 20))
    # TODO(synk): if `budget` approaches v7x's 64 MiB per-TC VMEM (very wide hidden
    # layers), stream the per-layer weights with pltpu.emit_pipeline / manual
    # make_async_copy instead of keeping every layer resident.

    out = pl.pallas_call(
        _make_fused_kernel(plan),
        out_shape=jax.ShapeDtypeStruct((b_pad, out_pad), dtype),
        grid=grid,
        in_specs=in_specs,
        out_specs=out_specs,
        compiler_params=pltpu.CompilerParams(
            dimension_semantics=("parallel",),
            vmem_limit_bytes=vmem_limit),
    )(x, *packed)
    return out[:B, :out_true]


# ----------------------------- parameters ---------------------------------- #

def _init_linear(key, in_size, out_size):
    # PyTorch nn.Linear default init: U(-1/sqrt(in), 1/sqrt(in)).
    kw, kb = jax.random.split(key)
    bound = 1.0 / jnp.sqrt(jnp.float32(in_size))
    w = jax.random.uniform(kw, (in_size, out_size), jnp.float32, -bound, bound)
    b = jax.random.uniform(kb, (1, out_size), jnp.float32, -bound, bound)
    return w, b


def init_skip_mlp(key, input_size, h_sizes, output_size):
    params = []
    last = input_size
    for h in h_sizes:
        key, k_main, k_short = jax.random.split(key, 3)
        w, b = _init_linear(k_main, last, h)
        layer = {"w": w, "b": b}
        if last != h:                      # projected shortcut, else nn.Identity
            ws, bs = _init_linear(k_short, last, h)
            layer["ws"] = ws
            layer["bs"] = bs
        params.append(layer)
        last = h
    key, k_final = jax.random.split(key)
    w, b = _init_linear(k_final, last, output_size)
    params.append({"w": w, "b": b})
    return params


# ----------------------------- reference ----------------------------------- #

def skip_mlp_ref(params, *args):
    x = jnp.concatenate(args, axis=1)
    for p in params[:-1]:
        y = x @ p["w"] + p["b"]
        s = (x @ p["ws"] + p["bs"]) if "ws" in p else x
        x = _leaky_relu(y) + s
    return x @ params[-1]["w"] + params[-1]["b"]


# ----------------------------- main ----------------------------------------- #

if __name__ == "__main__":
    key = jax.random.PRNGKey(0)
    B = 8
    in_sizes = (16, 16)        # two forward() args, hstacked -> 32 features
    h_sizes = [32, 64]         # first SkipLinear: identity shortcut (32==32),
    out_size = 8               # second: projected shortcut (32 -> 64)

    k1, k2, kp = jax.random.split(key, 3)
    x1 = jax.random.normal(k1, (B, in_sizes[0]), jnp.float32)
    x2 = jax.random.normal(k2, (B, in_sizes[1]), jnp.float32)

    params = init_skip_mlp(kp, sum(in_sizes), h_sizes, out_size)
    packed, plan, in_pad, out_pad, out_true = pack_params(params, in_sizes)

    fwd = jax.jit(functools.partial(skip_mlp_forward, packed, plan,
                                    in_pad, out_pad, out_true))
    out = fwd(x1, x2)
    jax.block_until_ready(out)

    ref = skip_mlp_ref(params, x1, x2)
    assert out.shape == (B, out_size)
    # bf16 matmuls (f32 accumulation) -> relaxed tolerance vs the f32 reference.
    assert jnp.allclose(out, ref, atol=5e-2, rtol=5e-2), \
        float(jnp.max(jnp.abs(out - ref)))
    print("KERNEL_OK")
</pallas_src>

<mosaic_0001>
module attributes {stable_mosaic.version = 11 : i64} {
  func.func @kernel(%arg0: i32, %arg1: memref<8x128xf32, #tpu.memory_space<vmem>>, %arg2: memref<128x128xbf16, #tpu.memory_space<vmem>>, %arg3: memref<1x128xf32, #tpu.memory_space<vmem>>, %arg4: memref<128x256xbf16, #tpu.memory_space<vmem>>, %arg5: memref<1x256xf32, #tpu.memory_space<vmem>>, %arg6: memref<128x128xbf16, #tpu.memory_space<vmem>>, %arg7: memref<1x128xf32, #tpu.memory_space<vmem>>, %arg8: memref<8x128xf32, #tpu.memory_space<vmem>>) attributes {dimension_semantics = [#tpu.dimension_semantics<parallel>], iteration_bounds = array<i64: 1>, scalar_prefetch = 0 : i64, scratch_operands = 0 : i64, tpu.core_type = #tpu.core_type<tc>, window_params = [{transform_indices = @transform_0, window_bounds = array<i64: 8, 128>}, {pipeline_mode = #tpu.pipeline_mode<synchronous>, transform_indices = @transform_1, window_bounds = array<i64: 128, 128>}, {pipeline_mode = #tpu.pipeline_mode<synchronous>, transform_indices = @transform_2, window_bounds = array<i64: 1, 128>}, {pipeline_mode = #tpu.pipeline_mode<synchronous>, transform_indices = @transform_3, window_bounds = array<i64: 128, 256>}, {pipeline_mode = #tpu.pipeline_mode<synchronous>, transform_indices = @transform_4, window_bounds = array<i64: 1, 256>}, {pipeline_mode = #tpu.pipeline_mode<synchronous>, transform_indices = @transform_5, window_bounds = array<i64: 128, 128>}, {pipeline_mode = #tpu.pipeline_mode<synchronous>, transform_indices = @transform_6, window_bounds = array<i64: 1, 128>}, {transform_indices = @transform_7, window_bounds = array<i64: 8, 128>}]} {
    %c0 = arith.constant 0 : index
    %c0_0 = arith.constant 0 : index
    %0 = vector.load %arg1[%c0, %c0_0] : memref<8x128xf32, #tpu.memory_space<vmem>>, vector<8x128xf32>
    %c0_1 = arith.constant 0 : index
    %c0_2 = arith.constant 0 : index
    %1 = vector.load %arg2[%c0_1, %c0_2] : memref<128x128xbf16, #tpu.memory_space<vmem>>, vector<128x128xbf16>
    %c0_3 = arith.constant 0 : index
    %c0_4 = arith.constant 0 : index
    %2 = vector.load %arg3[%c0_3, %c0_4] : memref<1x128xf32, #tpu.memory_space<vmem>>, vector<1x128xf32>
    %3 = arith.truncf %0 : vector<8x128xf32> to vector<8x128xbf16>
    %cst = arith.constant dense<0.000000e+00> : vector<8x128xf32>
    %4 = tpu.matmul %3, %1, %cst {dimension_numbers = #tpu.dot_dimension_numbers<[1], [0], [0], [1], [0, 0, 1, 1], [], []>} : vector<8x128xbf16>, vector<128x128xbf16>, vector<8x128xf32> -> vector<8x128xf32>
    %5 = vector.broadcast %2 : vector<1x128xf32> to vector<8x128xf32>
    %6 = arith.addf %4, %5 : vector<8x128xf32>
    %cst_5 = arith.constant 0.00999999977 : f32
    %7 = vector.broadcast %cst_5 : f32 to vector<8x128xf32>
    %8 = arith.mulf %7, %6 : vector<8x128xf32>
    %9 = arith.maximumf %6, %8 : vector<8x128xf32>
    %10 = arith.addf %9, %0 : vector<8x128xf32>
    %c0_6 = arith.constant 0 : index
    %c0_7 = arith.constant 0 : index
    %11 = vector.load %arg4[%c0_6, %c0_7] : memref<128x256xbf16, #tpu.memory_space<vmem>>, vector<128x256xbf16>
    %c0_8 = arith.constant 0 : index
    %c0_9 = arith.constant 0 : index
    %12 = vector.load %arg5[%c0_8, %c0_9] : memref<1x256xf32, #tpu.memory_space<vmem>>, vector<1x256xf32>
    %13 = arith.truncf %10 : vector<8x128xf32> to vector<8x128xbf16>
    %cst_10 = arith.constant dense<0.000000e+00> : vector<8x256xf32>
    %14 = tpu.matmul %13, %11, %cst_10 {dimension_numbers = #tpu.dot_dimension_numbers<[1], [0], [0], [1], [0, 0, 1, 1], [], []>} : vector<8x128xbf16>, vector<128x256xbf16>, vector<8x256xf32> -> vector<8x256xf32>
    %15 = vector.broadcast %12 : vector<1x256xf32> to vector<8x256xf32>
    %16 = arith.addf %14, %15 : vector<8x256xf32>
    %17 = vector.extract_strided_slice %16 {offsets = [0, 0], sizes = [8, 128], strides = [1, 1]} : vector<8x256xf32> to vector<8x128xf32>
    %cst_11 = arith.constant 0.00999999977 : f32
    %18 = vector.broadcast %cst_11 : f32 to vector<8x128xf32>
    %19 = arith.mulf %18, %17 : vector<8x128xf32>
    %20 = arith.maximumf %17, %19 : vector<8x128xf32>
    %21 = vector.extract_strided_slice %16 {offsets = [0, 128], sizes = [8, 128], strides = [1, 1]} : vector<8x256xf32> to vector<8x128xf32>
    %22 = arith.addf %20, %21 : vector<8x128xf32>
    %c0_12 = arith.constant 0 : index
    %c0_13 = arith.constant 0 : index
    %23 = vector.load %arg6[%c0_12, %c0_13] : memref<128x128xbf16, #tpu.memory_space<vmem>>, vector<128x128xbf16>
    %c0_14 = arith.constant 0 : index
    %c0_15 = arith.constant 0 : index
    %24 = vector.load %arg7[%c0_14, %c0_15] : memref<1x128xf32, #tpu.memory_space<vmem>>, vector<1x128xf32>
    %25 = arith.truncf %22 : vector<8x128xf32> to vector<8x128xbf16>
    %cst_16 = arith.constant dense<0.000000e+00> : vector<8x128xf32>
    %26 = tpu.matmul %25, %23, %cst_16 {dimension_numbers = #tpu.dot_dimension_numbers<[1], [0], [0], [1], [0, 0, 1, 1], [], []>} : vector<8x128xbf16>, vector<128x128xbf16>, vector<8x128xf32> -> vector<8x128xf32>
    %27 = vector.broadcast %24 : vector<1x128xf32> to vector<8x128xf32>
    %28 = arith.addf %26, %27 : vector<8x128xf32>
    %c0_17 = arith.constant 0 : index
    %c0_18 = arith.constant 0 : index
    %29 = vector.load %arg8[%c0_17, %c0_18] : memref<8x128xf32, #tpu.memory_space<vmem>>, vector<8x128xf32>
    tpu.vector_store %arg8[%c0_17, %c0_18], %28 {strides = array<i32>} : memref<8x128xf32, #tpu.memory_space<vmem>>, vector<8x128xf32>,
    return
  }
  func.func @transform_0(%arg0: i32) -> (i32, i32) {
    %c0_i32 = arith.constant 0 : i32
    %c0_i32_0 = arith.constant 0 : i32
    return %arg0, %c0_i32 : i32, i32
  }
  func.func @transform_1(%arg0: i32) -> (i32, i32) {
    %c0_i32 = arith.constant 0 : i32
    %c0_i32_0 = arith.constant 0 : i32
    %c0_i32_1 = arith.constant 0 : i32
    return %c0_i32, %c0_i32_0 : i32, i32
  }
  func.func @transform_2(%arg0: i32) -> (i32, i32) {
    %c0_i32 = arith.constant 0 : i32
    %c0_i32_0 = arith.constant 0 : i32
    %c0_i32_1 = arith.constant 0 : i32
    return %c0_i32, %c0_i32_0 : i32, i32
  }
  func.func @transform_3(%arg0: i32) -> (i32, i32) {
    %c0_i32 = arith.constant 0 : i32
    %c0_i32_0 = arith.constant 0 : i32
    %c0_i32_1 = arith.constant 0 : i32
    return %c0_i32, %c0_i32_0 : i32, i32
  }
  func.func @transform_4(%arg0: i32) -> (i32, i32) {
    %c0_i32 = arith.constant 0 : i32
    %c0_i32_0 = arith.constant 0 : i32
    %c0_i32_1 = arith.constant 0 : i32
    return %c0_i32, %c0_i32_0 : i32, i32
  }
  func.func @transform_5(%arg0: i32) -> (i32, i32) {
    %c0_i32 = arith.constant 0 : i32
    %c0_i32_0 = arith.constant 0 : i32
    %c0_i32_1 = arith.constant 0 : i32
    return %c0_i32, %c0_i32_0 : i32, i32
  }
  func.func @transform_6(%arg0: i32) -> (i32, i32) {
    %c0_i32 = arith.constant 0 : i32
    %c0_i32_0 = arith.constant 0 : i32
    %c0_i32_1 = arith.constant 0 : i32
    return %c0_i32, %c0_i32_0 : i32, i32
  }
  func.func @transform_7(%arg0: i32) -> (i32, i32) {
    %c0_i32 = arith.constant 0 : i32
    %c0_i32_0 = arith.constant 0 : i32
    return %arg0, %c0_i32 : i32, i32
  }
}

</mosaic_0001>

<bundles_post_ra>
// kernel: skip_mlp_forward.1
= control target key start
LH: loop header
LB: loop body
LE: loop exit
PB: predicated region body
PF: predicated region fallthrough
CT: control target
= control target key end

     0   :  { %v584_v1 = vmov 0.0   ;;  %vm585_vm0 = vmmov 0   ;;  %s768_s0 = inlined_call_operand.vmem [shape: f32[8,128], index: 0, kind: input, shape index: {}]   ;;  %s769_s1 = inlined_call_operand.vmem [shape: bf16[128,128], index: 1, kind: input, shape index: {}]   ;;  %s770_s2 = inlined_call_operand.vmem [shape: f32[1,128], index: 2, kind: input, shape index: {}]   ;;  %s771_s3 = inlined_call_operand.vmem [shape: bf16[128,256], index: 3, kind: input, shape index: {}]   ;;  %s772_s4 = inlined_call_operand.vmem [shape: f32[1,256], index: 4, kind: input, shape index: {}]   ;;  %s773_s5 = inlined_call_operand.vmem [shape: bf16[128,128], index: 5, kind: input, shape index: {}]   ;;  %s774_s6 = inlined_call_operand.vmem [shape: f32[1,128], index: 6, kind: input, shape index: {}]   ;;  %s775_s7 = inlined_call_operand.hbm [shape: f32[8,128], index: 7, kind: output, shape index: {}]  }
   0x1   :  { %v520_v0 = vld [vmem:[%s769_s1] sm:$0xff]   ;;  %476 = vmatprep.subr.bf16.mxu0 %v584_v1  ;;  %v521_v2 = vld [vmem:[%s769_s1 + $0x8] sm:$0xff]   ;;  %492 = vmatprep.mubr.msk.bf16.mxu0 %vm585_vm0, %v584_v1  ;;  %v522_v3 = vld [vmem:[%s769_s1 + $0x10] sm:$0xff]  }
   0x2   :  { %477 = vmatpush3.bf16.msra.mxu0 %v520_v0  ;;  %v528_v4 = vld [vmem:[%s771_s3 + $0x4] ss:$8 sps:$4 sm:$0xff]   ;;  %v530_v5 = vld [vmem:[%s771_s3] ss:$8 sps:$4 sm:$0xff]   ;;  %v523_v6 = vld [vmem:[%s769_s1 + $0x18] sm:$0xff]  }
   0x3   :  { %478 = vmatprep.subr.bf16.mxu0 %v584_v1  ;;  %v531_v7 = vld [vmem:[%s771_s3 + $0x14] ss:$8 sps:$4 sm:$0xff]   ;;  %253 = vmatprep.subr.bf16.mxu1 %v528_v4  ;;  %v533_v8 = vld [vmem:[%s771_s3 + $0x10] ss:$8 sps:$4 sm:$0xff]   ;;  %v534_v9 = vld [vmem:[%s771_s3 + $0x24] ss:$8 sps:$4 sm:$0xff]  }
   0x4   :  { %254 = vmatpush1.bf16.msra.mxu1 %v530_v5  ;;  %v524_v10 = vld [vmem:[%s769_s1 + $0x20] sm:$0xff]   ;;  %v525_v12 = vld [vmem:[%s769_s1 + $0x28] sm:$0xff]   ;;  %v537_v13 = vld [vmem:[%s771_s3 + $0x34] ss:$8 sps:$4 sm:$0xff]  }
   0x5   :  { %255 = vmatprep.subr.bf16.mxu1 %v531_v7  ;;  %v536_v11 = vld [vmem:[%s771_s3 + $0x20] ss:$8 sps:$4 sm:$0xff]   ;;  %v539_v14 = vld [vmem:[%s771_s3 + $0x30] ss:$8 sps:$4 sm:$0xff]   ;;  %v540_v15 = vld [vmem:[%s771_s3 + $0x44] ss:$8 sps:$4 sm:$0xff]  }
   0x6   :  { %479 = vmatpush3.bf16.msra.mxu0 %v521_v2  ;;  %v526_v16 = vld [vmem:[%s769_s1 + $0x30] sm:$0xff]  }
   0x7   :  { %480 = vmatprep.subr.bf16.mxu0 %v584_v1 }
   0x8   :  { %256 = vmatpush1.bf16.msra.mxu1 %v533_v8 }
   0x9   :  { %257 = vmatprep.subr.bf16.mxu1 %v534_v9 }
   0xa   :  { %481 = vmatpush3.bf16.msra.mxu0 %v522_v3 }
   0xb   :  { %482 = vmatprep.subr.bf16.mxu0 %v584_v1 }
   0xc   :  { %258 = vmatpush1.bf16.msra.mxu1 %v536_v11 }
   0xd   :  { %259 = vmatprep.subr.bf16.mxu1 %v537_v13 }
   0xe   :  { %483 = vmatpush3.bf16.msra.mxu0 %v523_v6 }
   0xf   :  { %484 = vmatprep.subr.bf16.mxu0 %v584_v1 }
  0x12   :  { %485 = vmatpush3.bf16.msra.mxu0 %v524_v10 }
  0x13   :  { %486 = vmatprep.subr.bf16.mxu0 %v584_v1 }
  0x16   :  { %487 = vmatpush3.bf16.msra.mxu0 %v525_v12 }
  0x17   :  { %488 = vmatprep.subr.bf16.mxu0 %v584_v1 }
  0x18   :  { %12 = vsyncpa [#allocation3], 0  ;;  %260 = vmatpush1.bf16.msra.mxu1 %v539_v14  ;;  %v542_v17 = vld [vmem:[%s771_s3 + $0x40] ss:$8 sps:$4 sm:$0xff]   ;;  %v543_v18 = vld [vmem:[%s771_s3 + $0x54] ss:$8 sps:$4 sm:$0xff]   ;;  %v163_v46 = vlaneseq }
  0x19   :  { %261 = vmatprep.subr.bf16.mxu1 %v540_v15  ;;  %v527_v19 = vld [vmem:[%s769_s1 + $0x38] sm:$0xff]   ;;  %v28_v20 = vld [vmem:[%s768_s0] sm:$0xff]  ;;  %v586_v27 = vmov 0   ;;  %v553_v29 = vld [vmem:[%s773_s5 + $0x8] sm:$0xff]   ;;  %s587_s0 = smov [#allocation2]  }
  0x1a   :  { %489 = vmatpush3.bf16.msra.mxu0 %v526_v16  ;;  %v46_v21 = vpack.c.bf16 %v28_v20, %v28_v20  ;;  %v545_v22 = vld [vmem:[%s771_s3 + $0x50] ss:$8 sps:$4 sm:$0xff]   ;;  %v546_v23 = vld [vmem:[%s771_s3 + $0x64] ss:$8 sps:$4 sm:$0xff]   ;;  %v548_v24 = vld [vmem:[%s771_s3 + $0x60] ss:$8 sps:$4 sm:$0xff]   ;;  %285 = vmatprep.mubr.bf16.mxu1 %v586_v27 }
  0x1b   :  { %490 = vmatprep.subr.bf16.mxu0 %v584_v1  ;;  %v549_v25 = vld [vmem:[%s771_s3 + $0x74] ss:$8 sps:$4 sm:$0xff]   ;;  %v551_v26 = vld [vmem:[%s771_s3 + $0x70] ss:$8 sps:$4 sm:$0xff]   ;;  %v552_v28 = vld [vmem:[%s773_s5] sm:$0xff]   ;;  %v164_v47 = vshrl.u32 %v163_v46, 7 }
  0x1c   :  { %262 = vmatpush1.bf16.msra.mxu1 %v542_v17  ;;  %v554_v30 = vld [vmem:[%s773_s5 + $0x10] sm:$0xff]   ;;  %v555_v31 = vld [vmem:[%s773_s5 + $0x18] sm:$0xff]   ;;  %v556_v32 = vld [vmem:[%s773_s5 + $0x20] sm:$0xff]  }
  0x1d   :  { %263 = vmatprep.subr.bf16.mxu1 %v543_v18  ;;  %v424_v33 = vld [vmem:[%s770_s2] ss:$0 sm:$0xff]  ;;  %v557_v43 = vld [vmem:[%s773_s5 + $0x28] sm:$0xff]   ;;  %v558_v44 = vld [vmem:[%s773_s5 + $0x30] sm:$0xff]   ;;  %v165_v48 = vsub.s32 0, %v164_v47  ;;  %v169_v51 = vsub.s32 1, %v164_v47 }
  0x1e   :  { %491 = vmatpush3.bf16.msra.mxu0 %v527_v19  ;;  %v559_v45 = vld [vmem:[%s773_s5 + $0x38] sm:$0xff]   ;;  %v160_v49 = vld [vmem:[%s772_s4] sm:$0x3]  ;;  %s416_s4 = sshll.u32 %s587_s0, 4  ;;  %s417_s4 = int_to_ptr.vmem [resolvable:$true] %s416_s4 }
  0x1f   :  { %496 = vmatprep.subr.bf16.mxu0 %v584_v1  ;;  %v166_v50 = vrot.slane %v160_v49, %v165_v48  ;;  %v170_v54 = vrot.slane %v160_v49, %v169_v51  ;;  %v449_v63 = vld [vmem:[%s774_s6] ss:$0 sm:$0xff]  ;;  %s560_s21 = scalar_lea.vmem %s417_s4, 128  ;;  %p565_p1 = scmp.lt.s32.totalorder %s417_s4, %s417_s4 }
  0x20   :  { %264 = vmatpush1.bf16.msra.mxu1 %v545_v22  ;;  %p561_p0 = scmp.ne.s32.totalorder %s417_s4, %s560_s21  ;;  %p566_p2 = scmp.lt.s32.totalorder %s560_s21, %s560_s21 }
  0x21   :  { %493 = vmatmul.mubr.bf16.vlgmr.msra.gmra.mrb[0].mxu0 %v46_v21  ;;  %265 = vmatprep.subr.bf16.mxu1 %v546_v23 }
  0x22   :  { %512 = vmatprep.mubr.msk.bf16.mxu0 %vm585_vm0, %v584_v1  ;;  %497 = vmatpush3.bf16.msra.mxu0 %v552_v28  ;;  %p567_p3 = por %p566_p2, %p565_p1 }
  0x23   :  { %498 = vmatprep.subr.bf16.mxu0 %v584_v1 }
  0x24   :  { %266 = vmatpush1.bf16.msra.mxu1 %v548_v24  ;;  %p568_p4 = pnand %p567_p3, %p561_p0 }
  0x25   :  { %267 = vmatprep.subr.bf16.mxu1 %v549_v25 }
  0x26   :  { %499 = vmatpush3.bf16.msra.mxu0 %v553_v29 }
  0x27   :  { %500 = vmatprep.subr.bf16.mxu0 %v584_v1 }
  0x28   :  { %268 = vmatpush1.bf16.msra.mxu1 %v551_v26 }
  0x2a   :  { %501 = vmatpush3.bf16.msra.mxu0 %v554_v30 }
  0x2b   :  { %502 = vmatprep.subr.bf16.mxu0 %v584_v1 }
  0x2e   :  { %503 = vmatpush3.bf16.msra.mxu0 %v555_v31 }
  0x2f   :  { %504 = vmatprep.subr.bf16.mxu0 %v584_v1 }
  0x32   :  { %505 = vmatpush3.bf16.msra.mxu0 %v556_v32 }
  0x33   :  { %506 = vmatprep.subr.bf16.mxu0 %v584_v1 }
  0x36   :  { %507 = vmatpush3.bf16.msra.mxu0 %v557_v43 }
  0x37   :  { %508 = vmatprep.subr.bf16.mxu0 %v584_v1 }
  0x3a   :  { %509 = vmatpush3.bf16.msra.mxu0 %v558_v44 }
  0x3b   :  { %510 = vmatprep.subr.bf16.mxu0 %v584_v1 }
  0x3e   :  { %511 = vmatpush3.bf16.msra.mxu0 %v559_v45 }
  0xf4   :  { %v135_v34 = vpop.f32.mrb[0].mxu0 }
  0xf5   :  { %v136_v35 = vadd.f32 %v424_v33, %v135_v34  ;;  %v494_v36 = vpop.f32.mrb[1].mxu0 }
  0xf6   :  { %v138_v37 = vpop.f32.mrb[2].mxu0 }
  0xf7   :  { %v141_v38 = vmul.f32 0.01, %v136_v35  ;;  %v495_v39 = vpop.f32.mrb[3].mxu0 }
  0xf9   :  { %v142_v40 = vmax.f32 %v136_v35, %v141_v38 }
  0xfb   :  { %v143_v41 = vadd.f32 %v142_v40, %v28_v20 }
  0xfd   :  { %v161_v42 = vpack.c.bf16 %v143_v41, %v143_v41 }
  0xff   :  { %286 = vmatmul.mubr.bf16.vlgmr.msra.gmra.mrb[0].mxu1 %v161_v42 }
 0x1d2   :  { %v287_v52 = vpop.f32.mrb[0].mxu1 }
 0x1d3   :  { %v288_v53 = vadd.f32 %v287_v52, %v166_v50  ;;  %v289_v55 = vpop.f32.mrb[1].mxu1 }
 0x1d4   :  { %v291_v56 = vpop.f32.mrb[2].mxu1  ;;  %v290_v60 = vadd.f32 %v289_v55, %v170_v54 }
 0x1d5   :  { %v294_v57 = vmul.f32 0.01, %v288_v53  ;;  %v292_v58 = vpop.f32.mrb[3].mxu1 }
 0x1d7   :  { %v295_v59 = vmax.f32 %v288_v53, %v294_v57 }
 0x1d9   :  { %v296_v61 = vadd.f32 %v295_v59, %v290_v60 }
 0x1db   :  { %v314_v62 = vpack.c.bf16 %v296_v61, %v296_v61 }
 0x1dd   :  { %513 = vmatmul.mubr.bf16.vlgmr.msra.gmra.mrb[4].mxu0 %v314_v62 }
 0x2b0   :  { %v403_v0 = vpop.f32.mrb[4].mxu0 }
 0x2b1   :  { %v404_v1 = vadd.f32 %v449_v63, %v403_v0  ;;  %v514_v2 = vpop.f32.mrb[5].mxu0 }
 0x2b2   :  { %v406_v3 = vpop.f32.mrb[6].mxu0 }
 0x2b3   :  { %409 = vst [vmem:[#allocation2] sm:$0xff] %v404_v1  ;;  %v515_v4 = vpop.f32.mrb[7].mxu0 }
 0x2b4   :  { %571 = shalt.err (!%p568_p4)
}
 0x2b5   :  { %s572_s6 = scalar_lea.hbm %s775_s7, 128 }
 0x2b6   :  { %p573_p5 = scmp.ne.s32.totalorder %s775_s7, %s572_s6  ;;  %p576_p6 = scmp.lt.u32.totalorder %s572_s6, %s775_s7 }
 0x2b8   :  { %p578_p7 = pnand %p576_p6, %p573_p5 }
 0x2ba   :  { %581 = shalt.err (!%p578_p7)
}
 0x2bb   :  { %419 = dma.vmem_to_hbm [thread:$0]  %s417_s4, 128, %s775_s7, [#allocation3]  }
 0x2bc   :  { %582 = dma.done.wait [#allocation3], 128  }
 0x2bd   :  { %583 = vsyncadd [#allocation3], 4294967168 }
 0x2be   :  { %423 = vsyncpa [#allocation3], 1 }

</bundles_post_ra>
